<compile_context>
chip_gen: v5e
topology: v5e:2x2
jax: 0.10.0
libtpu: 0.0.40
codegen_flags: <defaults>
</compile_context>

<pallas_src>
import functools

import numpy as np

import jax
import jax.numpy as jnp
from jax.experimental import pallas as pl
from jax.experimental.pallas import tpu as pltpu


def _make_pairs(ni, arch_interaction_itself):
    # Matches the torch li/lj enumeration order exactly.
    offset = 1 if arch_interaction_itself else 0
    return tuple((i, j) for i in range(ni) for j in range(i + offset))


@functools.lru_cache(maxsize=None)
def _build_constants(d, ni, pairs):
    """Resident 0/1 constants for the kernel (built once, in numpy).

    perm:    (F, n_shift*F)  block-permutation; (t @ perm) holds the fused feature
             slab "rolled" by shift*d lanes for each needed shift.
    reducer: ((1+n_shift)*F, n_pad)  RHS of the single output matmul emitting
             [x passthrough | per-pair d-lane sums | zero pad] — exact (0/1).
    """
    F = ni * d
    # (shift, block) location of every pair product, using the minimal shift set.
    locs = []
    for (i, j) in pairs:
        s, blk = i - j, i
        if s > ni - s:                      # use the wrap-around copy instead
            s, blk = ni - s, j
        locs.append((s, blk))
    shifts = sorted({s for (s, _) in locs})

    perm = np.zeros((F, len(shifts) * F), dtype=np.float32)
    for si, s in enumerate(shifts):
        for b in range(ni):
            src = ((b - s) % ni) * d
            dst = si * F + b * d
            perm[src:src + d, dst:dst + d] = np.eye(d, dtype=np.float32)

    npairs = len(pairs)
    n_out = d + npairs
    n_pad = ((n_out + 127) // 128) * 128
    red = np.zeros(((1 + len(shifts)) * F, n_pad), dtype=np.float32)
    red[:d, :d] = np.eye(d, dtype=np.float32)          # x passthrough (block 0 of t)
    for c, (s, blk) in enumerate(locs):
        row0 = (1 + shifts.index(s)) * F + blk * d
        red[row0:row0 + d, d + c] = 1.0                # sum the pair's d lanes
    return perm, red, n_out, n_pad


def _interact_kernel(t_ref, perm_ref, red_ref, r_ref):
    """t: (tb, F) fused features; perm/red: resident constants; r: (tb, n_pad)."""
    t = t_ref[...].astype(jnp.float32)
    f = t.shape[1]
    # Shifted copies of the slab via a constant block-permutation matmul
    # (all operands full-vreg; lane slices below land on 128-lane boundaries).
    g = jnp.dot(t, perm_ref[...], preferred_element_type=jnp.float32)
    n_shift = perm_ref.shape[1] // f
    prods = [t * g[:, s * f:(s + 1) * f] for s in range(n_shift)]
    lhs = jnp.concatenate([t] + prods, axis=1)          # (tb, (1+n_shift)*F)
    # One MXU matmul emits the already-concatenated, lane-dense
    # [x | pair_dots | 0-pad]; the 0/1 reducer keeps it exact in f32.
    r = jnp.dot(lhs, red_ref[...], preferred_element_type=jnp.float32)
    r_ref[...] = r.astype(r_ref.dtype)                  # full-lane, unmasked store


def _pick_tb(B):
    # Largest power-of-two tile (<=2048) that divides B and leaves >=2 grid steps
    # (so v7x's two TensorCores both get work); >=512 rows amortizes the
    # ~0.35us/step overhead at production batches.  Always a multiple of 8
    # (the (8,128) block constraint) or equal to B (full-dim block).
    for cand in (2048, 1024, 512, 256, 128, 64, 32, 16, 8):
        if B % cand == 0 and B // cand >= 2:
            return cand
    return B


def _interact_pallas(t, *, d, ni, pairs, tb=None):
    B, F = t.shape
    perm, red, n_out, n_pad = _build_constants(d, ni, pairs)
    if tb is None:
        tb = _pick_tb(B)
    Bp = pl.cdiv(B, tb) * tb
    if Bp != B:
        t = jnp.pad(t, ((0, Bp - B), (0, 0)))
    out = pl.pallas_call(
        _interact_kernel,
        out_shape=jax.ShapeDtypeStruct((Bp, n_pad), t.dtype),
        grid=(Bp // tb,),
        in_specs=[
            pl.BlockSpec((tb, F), lambda i: (i, 0)),
            # Constant index_map -> DMA'd once, stays VMEM-resident across steps.
            pl.BlockSpec(perm.shape, lambda i: (0, 0)),
            pl.BlockSpec(red.shape, lambda i: (0, 0)),
        ],
        out_specs=pl.BlockSpec((tb, n_pad), lambda i: (i, 0)),
        compiler_params=pltpu.CompilerParams(
            dimension_semantics=("parallel",)),
    )(t, jnp.asarray(perm), jnp.asarray(red))
    return out[:B, :n_out]


def dlrm_interact_features(x, ly_0, ly_1, ly_2, arch_interaction_itself=False,
                           *, use_pallas=None, pallas_batch_threshold=512, tb=None):
    """R = cat([x, Zflat]); Z = T @ T^T over rows of T = cat([x, ly_0, ly_1, ly_2]).

    Matches the PyTorch module (arch_interaction_op='dot') exactly for B == 1 (the
    only batch size the torch `.view(1, len(data))` supports) and returns the
    natural per-row generalization [x_b | pair_dots_b] for B > 1.
    """
    B, d = x.shape
    ly = [ly_0, ly_1, ly_2]
    ni = 1 + len(ly)
    pairs = _make_pairs(ni, arch_interaction_itself)

    if use_pallas is None:
        use_pallas = B >= pallas_batch_threshold

    if not use_pallas:
        # Tiny batches (incl. the reference's forced B==1): the pallas_call
        # boundary costs more than the whole computation — let XLA fuse this.
        T = jnp.concatenate([x] + ly, axis=1).reshape(B, ni, d)
        Z = jnp.einsum("bid,bjd->bij", T, T)
        zflat = jnp.stack([Z[:, i, j] for (i, j) in pairs], axis=1)
        return jnp.concatenate([x, zflat], axis=1)

    # TODO(synk): in a full DLRM, check this concat fuses into the bottom-MLP /
    # embedding producers; if it materializes a (B, ni*d) HBM buffer, accept the
    # four inputs with (tb, d) BlockSpecs instead to avoid an extra pass over T.
    t = jnp.concatenate([x] + ly, axis=1)                # lane-dense (B, ni*d)
    return _interact_pallas(t, d=d, ni=ni, pairs=pairs, tb=tb)


def _reference_b1(x, ly, arch_interaction_itself=False):
    # Pure-JAX transcription of the PyTorch forward (arch_interaction_op='dot').
    B, d = x.shape
    T = jnp.concatenate([x] + ly, axis=1).reshape(B, -1, d)
    Z = jnp.einsum("bid,bjd->bij", T, T)
    ni = T.shape[1]
    offset = 1 if arch_interaction_itself else 0
    li = [i for i in range(ni) for j in range(i + offset)]
    lj = [j for i in range(ni) for j in range(i + offset)]
    data = [Z[:, i, j] for i, j in zip(li, lj)]
    Zflat = jnp.concatenate(data).reshape(1, len(data))  # torch: requires B == 1
    return jnp.concatenate([x, Zflat], axis=1)


if __name__ == "__main__":
    key = jax.random.PRNGKey(0)
    d = 32  # m_spa

    # --- Module-faithful case: batch 1 (forced by the torch .view(1, .)). -------
    kx, k0, k1, k2, kb = jax.random.split(key, 5)
    x1 = jax.random.normal(kx, (1, d), dtype=jnp.float32)
    l0 = jax.random.normal(k0, (1, d), dtype=jnp.float32)
    l1 = jax.random.normal(k1, (1, d), dtype=jnp.float32)
    l2 = jax.random.normal(k2, (1, d), dtype=jnp.float32)
    out1 = jax.block_until_ready(dlrm_interact_features(x1, l0, l1, l2))
    ref1 = _reference_b1(x1, [l0, l1, l2])
    assert out1.shape == ref1.shape, (out1.shape, ref1.shape)
    assert jnp.allclose(out1, ref1, atol=1e-5, rtol=1e-5), "B=1 mismatch vs reference"

    # --- Pallas path at a batched shape (per-row generalization). ---------------
    B = 256
    xb = jax.random.normal(kb, (B, 4 * d), dtype=jnp.float32)
    xB, lB0 = xb[:, :d], xb[:, d:2 * d]
    lB1, lB2 = xb[:, 2 * d:3 * d], xb[:, 3 * d:]
    out_pl = dlrm_interact_features(xB, lB0, lB1, lB2, use_pallas=True)
    out_pl = jax.block_until_ready(out_pl)
    out_jx = dlrm_interact_features(xB, lB0, lB1, lB2, use_pallas=False)
    assert out_pl.shape == out_jx.shape == (B, d + 6), (out_pl.shape, out_jx.shape)
    assert jnp.allclose(out_pl, out_jx, atol=1e-4, rtol=1e-4), "pallas vs jax mismatch"

    print("KERNEL_OK")
</pallas_src>

<mosaic_0001>
module attributes {stable_mosaic.version = 11 : i64} {
  func.func @_interact_kernel(%arg0: i32, %arg1: memref<128x128xf32, #tpu.memory_space<vmem>>, %arg2: memref<128x256xf32, #tpu.memory_space<vmem>>, %arg3: memref<384x128xf32, #tpu.memory_space<vmem>>, %arg4: memref<128x128xf32, #tpu.memory_space<vmem>>) attributes {dimension_semantics = [#tpu.dimension_semantics<parallel>], iteration_bounds = array<i64: 2>, scalar_prefetch = 0 : i64, scratch_operands = 0 : i64, tpu.core_type = #tpu.core_type<tc>, window_params = [{transform_indices = @transform_0, window_bounds = array<i64: 128, 128>}, {pipeline_mode = #tpu.pipeline_mode<synchronous>, transform_indices = @transform_1, window_bounds = array<i64: 128, 256>}, {pipeline_mode = #tpu.pipeline_mode<synchronous>, transform_indices = @transform_2, window_bounds = array<i64: 384, 128>}, {transform_indices = @transform_3, window_bounds = array<i64: 128, 128>}]} {
    %c0 = arith.constant 0 : index
    %c0_0 = arith.constant 0 : index
    %0 = vector.load %arg1[%c0, %c0_0] : memref<128x128xf32, #tpu.memory_space<vmem>>, vector<128x128xf32>
    %c0_1 = arith.constant 0 : index
    %c0_2 = arith.constant 0 : index
    %1 = vector.load %arg2[%c0_1, %c0_2] : memref<128x256xf32, #tpu.memory_space<vmem>>, vector<128x256xf32>
    %cst = arith.constant dense<0.000000e+00> : vector<128x256xf32>
    %2 = tpu.matmul %0, %1, %cst {dimension_numbers = #tpu.dot_dimension_numbers<[1], [0], [0], [1], [0, 0, 1, 1], [], []>} : vector<128x128xf32>, vector<128x256xf32>, vector<128x256xf32> -> vector<128x256xf32>
    %3 = vector.extract_strided_slice %2 {offsets = [0, 0], sizes = [128, 128], strides = [1, 1]} : vector<128x256xf32> to vector<128x128xf32>
    %4 = arith.mulf %0, %3 : vector<128x128xf32>
    %5 = vector.extract_strided_slice %2 {offsets = [0, 128], sizes = [128, 128], strides = [1, 1]} : vector<128x256xf32> to vector<128x128xf32>
    %6 = arith.mulf %0, %5 : vector<128x128xf32>
    %7 = tpu.concatenate %0, %4, %6 in 1 : vector<128x128xf32>, vector<128x128xf32>, vector<128x128xf32> -> vector<128x384xf32>
    %c0_3 = arith.constant 0 : index
    %c0_4 = arith.constant 0 : index
    %8 = vector.load %arg3[%c0_3, %c0_4] : memref<384x128xf32, #tpu.memory_space<vmem>>, vector<384x128xf32>
    %cst_5 = arith.constant dense<0.000000e+00> : vector<128x128xf32>
    %9 = tpu.matmul %7, %8, %cst_5 {dimension_numbers = #tpu.dot_dimension_numbers<[1], [0], [0], [1], [0, 0, 1, 1], [], []>} : vector<128x384xf32>, vector<384x128xf32>, vector<128x128xf32> -> vector<128x128xf32>
    %c0_6 = arith.constant 0 : index
    %c0_7 = arith.constant 0 : index
    %10 = vector.load %arg4[%c0_6, %c0_7] : memref<128x128xf32, #tpu.memory_space<vmem>>, vector<128x128xf32>
    tpu.vector_store %arg4[%c0_6, %c0_7], %9 {strides = array<i32>} : memref<128x128xf32, #tpu.memory_space<vmem>>, vector<128x128xf32>,
    return
  }
  func.func @transform_0(%arg0: i32) -> (i32, i32) {
    %c0_i32 = arith.constant 0 : i32
    %c0_i32_0 = arith.constant 0 : i32
    return %arg0, %c0_i32 : i32, i32
  }
  func.func @transform_1(%arg0: i32) -> (i32, i32) {
    %c0_i32 = arith.constant 0 : i32
    %c0_i32_0 = arith.constant 0 : i32
    %c0_i32_1 = arith.constant 0 : i32
    return %c0_i32, %c0_i32_0 : i32, i32
  }
  func.func @transform_2(%arg0: i32) -> (i32, i32) {
    %c0_i32 = arith.constant 0 : i32
    %c0_i32_0 = arith.constant 0 : i32
    %c0_i32_1 = arith.constant 0 : i32
    return %c0_i32, %c0_i32_0 : i32, i32
  }
  func.func @transform_3(%arg0: i32) -> (i32, i32) {
    %c0_i32 = arith.constant 0 : i32
    %c0_i32_0 = arith.constant 0 : i32
    return %arg0, %c0_i32 : i32, i32
  }
}

</mosaic_0001>

<bundles_post_ra>
// kernel: tpu_custom_call.1
= control target key start
LH: loop header
LB: loop body
LE: loop exit
PB: predicated region body
PF: predicated region fallthrough
CT: control target
= control target key end

     0   :  { %8 = vsyncpa [#allocation3], 0  ;;  %s1434_s0 = inlined_call_operand.hbm [shape: f32[256,128], index: 0, kind: input, shape index: {}]   ;;  %s1435_s1 = inlined_call_operand.hbm [shape: f32[128,256], index: 1, kind: input, shape index: {}]   ;;  %s1436_s2 = inlined_call_operand.hbm [shape: f32[384,128], index: 2, kind: input, shape index: {}]   ;;  %s1437_s3 = inlined_call_operand.hbm [shape: f32[256,128], index: 3, kind: output, shape index: {}]  }
   0x1   :  { %10 = vsyncpa [#allocation3 + $0x1], 0 }
   0x2   :  { %11 = vsyncpa [#allocation6], 0 }
   0x3   :  { %12 = vsyncpa [#allocation4], 0 }
   0x4   :  { %14 = vsyncpa [#allocation4 + $0x1], 0  ;;  %s1134_s12 = smov 0   ;;  %s1136_s13 = smov 0  }
   0x5   :  { %s1138_s14 = smov 0   ;;  %s1140_s15 = smov 0  }
   0x6 LB: > { %s1155_s16 = sadd.s32 4294967295, %s1104_s15   ;;  %s803_s17 = sadd.s32 4294967294, %s1104_s15   ;;  %s1104_s15 = sphi %s1140_s15, %s1447_s15   ;;  %s1100_s14 = sphi %s1138_s14, %s1446_s14   ;;  %s1096_s13 = sphi %s1136_s13, %s1445_s13   ;;  %s1092_s12 = sphi %s1134_s12, %s1444_s12  }
   0x7   : > { %p40_p0 = scmp.ne.s32.totalorder %s1096_s13, %s1092_s12  ;;  %p41_p1 = scmp.eq.s32.totalorder %s1155_s16, 0 }
   0x8   : > { %p106_p2 = scmp.eq.s32.totalorder %s1155_s16, 1  ;;  %p112_p3 = scmp.eq.s32.totalorder %s803_s17, 1 }
   0x9   : > { %p1164_p4 = por %p41_p1, %p40_p0  ;;  %p804_p5 = scmp.ge.s32.totalorder %s1104_s15, 1 }
   0xa   : > { %p1169_p6 = por %p112_p3, %p40_p0  ;;  %p119_p7 = scmp.lt.s32.totalorder %s1104_s15, 3 }
   0xb   : > { %s130_s22 = sshll.u32 %s1435_s1, 4  ;;  %s1106_s24 = smov [#allocation5]   ;;  %s131_s22 = int_to_ptr.hbm [resolvable:$true] %s130_s22 }
   0xc   : > { %p1177_p8 = pnand %p804_p5, %p119_p7  ;;  %s132_s25 = sshll.u32 %s1106_s24, 4  ;;  %s133_s25 = int_to_ptr.vmem [resolvable:$true] %s132_s25 }
   0xd   : > { %s144_s28 = sshll.u32 %s1436_s2, 4  ;;  %s1107_s29 = smov 256   ;;  %s145_s28 = int_to_ptr.hbm [resolvable:$true] %s144_s28 }
   0xe   : > { %p883_p9 = pneg %p1177_p8  ;;  %s1108_s30 = smov 16  }
   0xf   : > { %s1109_s4 = smov [#allocation7]   ;;  %s1110_s6 = smov 128  }
  0x10   : > { %p884_p10 = pnand %p883_p9, %p41_p1  ;;  %s146_s5 = sshll.u32 %s1109_s4, 4  ;;  %s147_s5 = int_to_ptr.vmem [resolvable:$true] %s146_s5 }
  0x11   : > { %s1111_s7 = smov 8   ;;  %s1193_s8 = sadd.s32 1, %s1104_s15  }
  0x12   : > { %886 = dma.hbm_to_vmem [thread:$0]  (!%p884_p10), %s131_s22, 4096, %s133_s25, [#allocation6], %s1107_s29, %s1107_s29, %s1108_s30  }
  0x13   : > { %889 = dma.hbm_to_vmem [thread:$0]  (!%p884_p10), %s145_s28, 6144, %s147_s5, [#allocation6], %s1110_s6, %s1110_s6, %s1111_s7  }
  0x14   : > { %s24_s9 = ssub.s32 %s1104_s15, %s1193_s8  ;;  %s27_s10 = sadd.s32 1, %s1100_s14 }
  0x15   : > { %p25_p12 = scmp.eq.s32.totalorder %s24_s9, 0  ;;  %p34_p13 = scmp.ne.s32.totalorder %s1100_s14, %s1096_s13 }
  0x16   : > { %p35_p0 = scmp.eq.s32.totalorder %s1104_s15, 0  ;;  %p900_p7 = scmp.lt.s32.totalorder %s1104_s15, 2 }
  0x17   : > { %s1202_s11 = scalar_select %p25_p12, %s1100_s14, %s27_s10  }
  0x18   : > { %p36_p3 = por %p35_p0, %p34_p13  ;;  %p1206_p5 = por %p106_p2, %p34_p13 }
  0x19   : > { %s160_s20 = sand.u32 1, %s1100_s14   ;;  %s821_s22 = sshll.u32 %s1104_s15, 7 }
  0x1a   : > { %s808_s21 = sshll.u32 %s160_s20, 7  ;;  %s169_s26 = scalar_lea.hbm %s1434_s0, %s821_s22 }
  0x1b   : > { %s164_s27 = scalar_lea.vmem [#allocation2], %s808_s21  ;;  %s170_s29 = sshll.u32 %s169_s26, 4  ;;  %s171_s29 = int_to_ptr.hbm [resolvable:$true] %s170_s29 }
  0x1c   : > { %s172_s28 = sshll.u32 %s164_s27, 4  ;;  %p1216_p9 = pnand %p900_p7, %p36_p3  ;;  %s173_s28 = int_to_ptr.vmem [resolvable:$true] %s172_s28 }
  0x1d   : > { %s161_s4 = scalar_lea.sflag [#allocation3], %s160_s20  ;;  %s1004_s5 = sshra.s32 %s171_s29, 4  ;;  %s1005_s5 = int_to_ptr.hbm [resolvable:$true] %s1004_s5 }
  0x1e   : > { %s1006_s9 = scalar_lea.hbm %s1005_s5, 128  ;;  %p1008_p10 = pneg %p1216_p9 }
  0x1f   : > { %p1007_p2 = scmp.ne.s32.totalorder %s1005_s5, %s1006_s9  ;;  %s1011_s22 = scalar_lea.hbm %s1434_s0, 256 }
  0x20   : > { %p1012_p0 = scmp.lt.s32.totalorder %s1005_s5, %s1434_s0  ;;  %p1013_p3 = scmp.lt.s32.totalorder %s1011_s22, %s1006_s9 }
  0x21   : > { %p1009_p12 = pnand %p1008_p10, %p1007_p2 }
  0x22   : > { %p1014_p7 = por %p1013_p3, %p1012_p0 }
  0x23   : > { %p1010_p13 = pneg %p1009_p12 }
  0x25   : > { %p1015_p11 = pnand %p1014_p7, %p1010_p13 }
  0x27   : > { %1018 = shalt.err (!%p1015_p11)
}
  0x28   : > { %893 = dma.hbm_to_vmem [thread:$0]  (!%p1216_p9), %s171_s29, 2048, %s173_s28, %s161_s4, %s1110_s6, %s1110_s6, %s1111_s7  }
  0x29   : > { %184 = sbr.rel (%p1177_p8) target bundleno = 493 (0x1ed), region = 32  ;;  %s1236_s20 = sand.u32 (!%p1177_p8), 1, %s1096_s13  }
  0x2a   : > { %s812_s26 = sshll.u32 (!%p1177_p8), %s1236_s20, 7  ;;  %s187_s27 = scalar_lea.sflag (!%p1177_p8), [#allocation3], %s1236_s20 }
  0x2b   : > { %s1242_s5 = scalar_lea.vmem (!%p1177_p8), [#allocation2], %s812_s26 }
  0x2e   : > { %1079 = dma.done.wait (%p1164_p4), %s187_s27, 2048  }
  0x2f   : > { %1081 = vsyncadd (%p1164_p4), %s187_s27, 4294965248 }
  0x30   : > { %1083 = dma.done.wait (%p41_p1), [#allocation6], 10240  }
  0x31   : > { %1085 = vsyncadd (%p41_p1), [#allocation6], 4294957056  ;;  %v272_v0 = vld [vmem:[#allocation5 + $0xf0] sm:$0xff]  ;;  %v270_v1 = vld [vmem:[#allocation5 + $0xe0] sm:$0xff]  ;;  %s1382_s18 = scalar_lea.vmem [#allocation8], %s812_s26  ;;  %s822_s23 = sshll.u32 %s1155_s16, 7 }
  0x32   : > { %274 = vmatpush.msra.mxu0 %v272_v0  ;;  %823 = vmatpush.msra.mxu1 %v272_v0  ;;  %v268_v2 = vld [vmem:[#allocation5 + $0xd0] sm:$0xff]  ;;  %v266_v3 = vld [vmem:[#allocation5 + $0xc0] sm:$0xff]  ;;  %v273_v18 = vld [vmem:[#allocation5 + $0xf8] sm:$0xff]  ;;  %s707_s28 = scalar_lea.hbm %s1437_s3, %s822_s23  ;;  %s708_s29 = sshll.u32 %s1382_s18, 4  ;;  %s709_s29 = int_to_ptr.vmem [resolvable:$true] %s708_s29 }
  0x33   : > { %824 = vmatpush.msra.mxu2 %v272_v0  ;;  %825 = vmatpush.msra.mxu3 %v272_v0  ;;  %v264_v4 = vld [vmem:[#allocation5 + $0xb0] sm:$0xff]  ;;  %v262_v5 = vld [vmem:[#allocation5 + $0xa0] sm:$0xff]  ;;  %v271_v19 = vld [vmem:[#allocation5 + $0xe8] sm:$0xff]  ;;  %s710_s30 = sshll.u32 %s707_s28, 4  ;;  %s696_s4 = scalar_lea.sflag [#allocation4], %s1236_s20  ;;  %s711_s30 = int_to_ptr.hbm [resolvable:$true] %s710_s30 }
  0x34   : > { %275 = vmatpush.msra.mxu0 %v270_v1  ;;  %826 = vmatpush.msra.mxu1 %v270_v1  ;;  %v260_v6 = vld [vmem:[#allocation5 + $0x90] sm:$0xff]  ;;  %v258_v7 = vld [vmem:[#allocation5 + $0x80] sm:$0xff]  ;;  %v269_v20 = vld [vmem:[#allocation5 + $0xd8] sm:$0xff]  ;;  %s1048_s16 = sshra.s32 %s711_s30, 4  ;;  %s1054_s22 = scalar_lea.hbm %s1437_s3, 256  ;;  %s1049_s16 = int_to_ptr.hbm [resolvable:$true] %s1048_s16 }
  0x35   : > { %827 = vmatpush.msra.mxu2 %v270_v1  ;;  %828 = vmatpush.msra.mxu3 %v270_v1  ;;  %v256_v8 = vld [vmem:[#allocation5 + $0x70] sm:$0xff]  ;;  %v254_v9 = vld [vmem:[#allocation5 + $0x60] sm:$0xff]  ;;  %v267_v21 = vld [vmem:[#allocation5 + $0xc8] sm:$0xff]  ;;  %s1050_s9 = scalar_lea.hbm %s1049_s16, 128  ;;  %p1055_p11 = scmp.lt.s32.totalorder %s1049_s16, %s1437_s3 }
  0x36   : > { %276 = vmatpush.msra.mxu0 %v268_v2  ;;  %829 = vmatpush.msra.mxu1 %v268_v2  ;;  %v252_v10 = vld [vmem:[#allocation5 + $0x50] sm:$0xff]  ;;  %v250_v11 = vld [vmem:[#allocation5 + $0x40] sm:$0xff]  ;;  %v1261_v22 = vld [vmem:[%s1242_s5 + $0x8] sm:$0xff]  ;;  %p1051_p1 = scmp.ne.s32.totalorder %s1049_s16, %s1050_s9  ;;  %p1056_p9 = scmp.lt.s32.totalorder %s1054_s22, %s1050_s9 }
  0x37   : > { %830 = vmatpush.msra.mxu2 %v268_v2  ;;  %831 = vmatpush.msra.mxu3 %v268_v2  ;;  %v248_v12 = vld [vmem:[#allocation5 + $0x30] sm:$0xff]  ;;  %v246_v13 = vld [vmem:[#allocation5 + $0x20] sm:$0xff]  ;;  %v1264_v23 = vld [vmem:[%s1242_s5 + $0x28] sm:$0xff] }
  0x38   : > { %277 = vmatpush.msra.mxu0 %v266_v3  ;;  %832 = vmatpush.msra.mxu1 %v266_v3  ;;  %v244_v14 = vld [vmem:[#allocation5 + $0x10] sm:$0xff]  ;;  %v242_v15 = vld [vmem:[#allocation5] sm:$0xff]  ;;  %v265_v24 = vld [vmem:[#allocation5 + $0xb8] sm:$0xff]  ;;  %p1052_p4 = pnand %p1051_p1, %p1206_p5  ;;  %p1057_p2 = por %p1056_p9, %p1055_p11 }
  0x39   : > { %833 = vmatpush.msra.mxu2 %v266_v3  ;;  %834 = vmatpush.msra.mxu3 %v266_v3  ;;  %v1253_v16 = vld [vmem:[%s1242_s5] sm:$0xff]  ;;  %v263_v25 = vld [vmem:[#allocation5 + $0xa8] sm:$0xff]  ;;  %v261_v26 = vld [vmem:[#allocation5 + $0x98] sm:$0xff] }
  0x3a   : > { %278 = vmatpush.msra.mxu0 %v264_v4  ;;  %835 = vmatpush.msra.mxu1 %v264_v4  ;;  %v1256_v17 = vld [vmem:[%s1242_s5 + $0x20] sm:$0xff]  ;;  %v259_v27 = vld [vmem:[#allocation5 + $0x88] sm:$0xff]  ;;  %v1269_v28 = vld [vmem:[%s1242_s5 + $0x10] sm:$0xff]  ;;  %p1053_p8 = pneg %p1052_p4 }
  0x3b   : > { %836 = vmatpush.msra.mxu2 %v264_v4  ;;  %837 = vmatpush.msra.mxu3 %v264_v4  ;;  %v1272_v29 = vld [vmem:[%s1242_s5 + $0x30] sm:$0xff]  ;;  %v257_v30 = vld [vmem:[#allocation5 + $0x78] sm:$0xff]  ;;  %v255_v31 = vld [vmem:[#allocation5 + $0x68] sm:$0xff] }
  0x3c   : > { %279 = vmatpush.msra.mxu0 %v262_v5  ;;  %838 = vmatpush.msra.mxu1 %v262_v5  ;;  %v253_v32 = vld [vmem:[#allocation5 + $0x58] sm:$0xff]  ;;  %v251_v33 = vld [vmem:[#allocation5 + $0x48] sm:$0xff]  ;;  %v1288_v40 = vld [vmem:[%s1242_s5 + $0x40] sm:$0xff]  ;;  %p1058_p10 = pnand %p1057_p2, %p1053_p8 }
  0x3d   : > { %839 = vmatpush.msra.mxu2 %v262_v5  ;;  %840 = vmatpush.msra.mxu3 %v262_v5  ;;  %v1277_v34 = vld [vmem:[%s1242_s5 + $0x18] sm:$0xff]  ;;  %v247_v37 = vld [vmem:[#allocation5 + $0x28] sm:$0xff]  ;;  %v1296_v42 = vld [vmem:[%s1242_s5 + $0x60] sm:$0xff] }
  0x3e   : > { %280 = vmatpush.msra.mxu0 %v260_v6  ;;  %841 = vmatpush.msra.mxu1 %v260_v6  ;;  %v1280_v35 = vld [vmem:[%s1242_s5 + $0x38] sm:$0xff]  ;;  %v243_v39 = vld [vmem:[#allocation5 + $0x8] sm:$0xff]  ;;  %v1302_v45 = vld [vmem:[%s1242_s5 + $0x50] sm:$0xff] }
  0x3f   : > { %842 = vmatpush.msra.mxu2 %v260_v6  ;;  %843 = vmatpush.msra.mxu3 %v260_v6  ;;  %v249_v36 = vld [vmem:[#allocation5 + $0x38] sm:$0xff]  ;;  %v1293_v41 = vld [vmem:[%s1242_s5 + $0x48] sm:$0xff]  ;;  %v450_v46 = vld [vmem:[#allocation7 + $0x70] sm:$0xff] }
  0x40   : > { %281 = vmatpush.msra.mxu0 %v258_v7  ;;  %844 = vmatpush.msra.mxu1 %v258_v7  ;;  %v245_v38 = vld [vmem:[#allocation5 + $0x18] sm:$0xff]  ;;  %v466_v47 = vld [vmem:[#allocation7 + $0xf0] sm:$0xff]  ;;  %v449_v48 = vld [vmem:[#allocation7 + $0x68] sm:$0xff] }
  0x41   : > { %845 = vmatpush.msra.mxu2 %v258_v7  ;;  %846 = vmatpush.msra.mxu3 %v258_v7  ;;  %v451_v43 = vld [vmem:[#allocation7 + $0x78] sm:$0xff]  ;;  %v465_v49 = vld [vmem:[#allocation7 + $0xe8] sm:$0xff]  ;;  %v448_v51 = vld [vmem:[#allocation7 + $0x60] sm:$0xff] }
  0x42   : > { %282 = vmatpush.msra.mxu0 %v256_v8  ;;  %847 = vmatpush.msra.mxu1 %v256_v8  ;;  %v467_v44 = vld [vmem:[#allocation7 + $0xf8] sm:$0xff]  ;;  %v1306_v50 = vld [vmem:[%s1242_s5 + $0x68] sm:$0xff]  ;;  %v464_v52 = vld [vmem:[#allocation7 + $0xe0] sm:$0xff] }
  0x43   : > { %848 = vmatpush.msra.mxu2 %v256_v8  ;;  %849 = vmatpush.msra.mxu3 %v256_v8  ;;  %v447_v53 = vld [vmem:[#allocation7 + $0x58] sm:$0xff]  ;;  %v446_v56 = vld [vmem:[#allocation7 + $0x50] sm:$0xff]  ;;  %v445_v58 = vld [vmem:[#allocation7 + $0x48] sm:$0xff] }
  0x44   : > { %283 = vmatpush.msra.mxu0 %v254_v9  ;;  %850 = vmatpush.msra.mxu1 %v254_v9  ;;  %v463_v54 = vld [vmem:[#allocation7 + $0xd8] sm:$0xff]  ;;  %v462_v57 = vld [vmem:[#allocation7 + $0xd0] sm:$0xff]  ;;  %v461_v59 = vld [vmem:[#allocation7 + $0xc8] sm:$0xff] }
  0x45   : > { %851 = vmatpush.msra.mxu2 %v254_v9  ;;  %852 = vmatpush.msra.mxu3 %v254_v9  ;;  %v1311_v55 = vld [vmem:[%s1242_s5 + $0x58] sm:$0xff]  ;;  %v1315_v60 = vld [vmem:[%s1242_s5 + $0x70] sm:$0xff]  ;;  %v444_v61 = vld [vmem:[#allocation7 + $0x40] sm:$0xff] }
  0x46   : > { %284 = vmatpush.msra.mxu0 %v252_v10  ;;  %853 = vmatpush.msra.mxu1 %v252_v10  ;;  %v460_v62 = vld [vmem:[#allocation7 + $0xc0] sm:$0xff]  ;;  %v443_v63 = vld [vmem:[#allocation7 + $0x38] sm:$0xff]  ;;  %v442_v1 = vld [vmem:[#allocation7 + $0x30] sm:$0xff] }
  0x47   : > { %854 = vmatpush.msra.mxu2 %v252_v10  ;;  %855 = vmatpush.msra.mxu3 %v252_v10  ;;  %v459_v0 = vld [vmem:[#allocation7 + $0xb8] sm:$0xff]  ;;  %v458_v2 = vld [vmem:[#allocation7 + $0xb0] sm:$0xff]  ;;  %v441_v3 = vld [vmem:[#allocation7 + $0x28] sm:$0xff] }
  0x48   : > { %285 = vmatpush.msra.mxu0 %v250_v11  ;;  %856 = vmatpush.msra.mxu1 %v250_v11  ;;  %v457_v4 = vld [vmem:[#allocation7 + $0xa8] sm:$0xff]  ;;  %v1320_v5 = vld [vmem:[%s1242_s5 + $0x78] sm:$0xff]  ;;  %v440_v6 = vld [vmem:[#allocation7 + $0x20] sm:$0xff] }
  0x49   : > { %857 = vmatpush.msra.mxu2 %v250_v11  ;;  %858 = vmatpush.msra.mxu3 %v250_v11  ;;  %v456_v7 = vld [vmem:[#allocation7 + $0xa0] sm:$0xff]  ;;  %v439_v8 = vld [vmem:[#allocation7 + $0x18] sm:$0xff]  ;;  %v438_v10 = vld [vmem:[#allocation7 + $0x10] sm:$0xff] }
  0x4a   : > { %286 = vmatpush.msra.mxu0 %v248_v12  ;;  %859 = vmatpush.msra.mxu1 %v248_v12  ;;  %v455_v9 = vld [vmem:[#allocation7 + $0x98] sm:$0xff]  ;;  %v454_v11 = vld [vmem:[#allocation7 + $0x90] sm:$0xff] }
  0x4b   : > { %860 = vmatpush.msra.mxu2 %v248_v12  ;;  %861 = vmatpush.msra.mxu3 %v248_v12  ;;  %v437_v12 = vld [vmem:[#allocation7 + $0x8] sm:$0xff] }
  0x4c   : > { %287 = vmatpush.msra.mxu0 %v246_v13  ;;  %862 = vmatpush.msra.mxu1 %v246_v13 }
  0x4d   : > { %863 = vmatpush.msra.mxu2 %v246_v13  ;;  %864 = vmatpush.msra.mxu3 %v246_v13  ;;  %v453_v13 = vld [vmem:[#allocation7 + $0x88] sm:$0xff] }
  0x4e   : > { %288 = vmatpush.msra.mxu0 %v244_v14  ;;  %865 = vmatpush.msra.mxu1 %v244_v14 }
  0x4f   : > { %866 = vmatpush.msra.mxu2 %v244_v14  ;;  %867 = vmatpush.msra.mxu3 %v244_v14  ;;  %v436_v14 = vld [vmem:[#allocation7] sm:$0xff] }
  0x50   : > { %289 = vmatpush.msra.mxu0 %v242_v15  ;;  %868 = vmatpush.msra.mxu1 %v242_v15 }
  0x51   : > { %290 = vmatmul.f32.vlgmr.msra.gmra.mxu0 %v1253_v16  ;;  %302 = vmatmul.f32.vlgmr.msra.gmra.mxu1 %v1256_v17 }
  0x52   : > { %339 = vmatpush.msrb.mxu1 %v273_v18  ;;  %869 = vmatpush.msra.mxu2 %v242_v15  ;;  %v483_v18 = vld [vmem:[#allocation7 + $0x178] sm:$0xff] }
  0x53   : > { %870 = vmatpush.msra.mxu3 %v242_v15  ;;  %314 = vmatmul.f32.vlgmr.msra.gmra.mxu2 %v1288_v40  ;;  %v452_v15 = vld [vmem:[#allocation7 + $0x80] sm:$0xff] }
  0x54   : > { %340 = vmatpush.msrb.mxu1 %v271_v19  ;;  %326 = vmatmul.f32.vlgmr.msra.gmra.mxu3 %v1296_v42  ;;  %v482_v19 = vld [vmem:[#allocation7 + $0x170] sm:$0xff] }
  0x55   : > { %484 = vmatpush.msrb.mxu2 %v451_v43  ;;  %549 = vmatpush.msrb.mxu3 %v467_v44 }
  0x56   : > { %341 = vmatpush.msrb.mxu1 %v269_v20  ;;  %614 = vmatpush.msrb.mxu0 %v483_v18  ;;  %v481_v20 = vld [vmem:[#allocation7 + $0x168] sm:$0xff] }
  0x57   : > { %485 = vmatpush.msrb.mxu2 %v450_v46  ;;  %550 = vmatpush.msrb.mxu3 %v466_v47  ;;  %v468_v46 = vld [vmem:[#allocation7 + $0x100] sm:$0xff] }
  0x58   : > { %342 = vmatpush.msrb.mxu1 %v267_v21  ;;  %615 = vmatpush.msrb.mxu0 %v482_v19  ;;  %v480_v21 = vld [vmem:[#allocation7 + $0x160] sm:$0xff] }
  0x59   : > { %293 = vmatmul.f32.gmra.mxu0 %v1261_v22  ;;  %305 = vmatmul.f32.gmra.mxu1 %v1264_v23 }
  0x5a   : > { %343 = vmatpush.msrb.mxu1 %v265_v24  ;;  %486 = vmatpush.msrb.mxu2 %v449_v48  ;;  %v479_v24 = vld [vmem:[#allocation7 + $0x158] sm:$0xff] }
  0x5b   : > { %317 = vmatmul.f32.gmra.mxu2 %v1293_v41  ;;  %551 = vmatpush.msrb.mxu3 %v465_v49 }
  0x5c   : > { %344 = vmatpush.msrb.mxu1 %v263_v25  ;;  %329 = vmatmul.f32.gmra.mxu3 %v1306_v50  ;;  %v478_v25 = vld [vmem:[#allocation7 + $0x150] sm:$0xff] }
  0x5d   : > { %487 = vmatpush.msrb.mxu2 %v448_v51  ;;  %552 = vmatpush.msrb.mxu3 %v464_v52 }
  0x5e   : > { %345 = vmatpush.msrb.mxu1 %v261_v26  ;;  %616 = vmatpush.msrb.mxu0 %v481_v20  ;;  %v477_v26 = vld [vmem:[#allocation7 + $0x148] sm:$0xff] }
  0x5f   : > { %488 = vmatpush.msrb.mxu2 %v447_v53  ;;  %553 = vmatpush.msrb.mxu3 %v463_v54 }
  0x60   : > { %346 = vmatpush.msrb.mxu1 %v259_v27  ;;  %617 = vmatpush.msrb.mxu0 %v480_v21  ;;  %v476_v27 = vld [vmem:[#allocation7 + $0x140] sm:$0xff] }
  0x61   : > { %296 = vmatmul.f32.gmra.mxu0 %v1269_v28  ;;  %308 = vmatmul.f32.gmra.mxu1 %v1272_v29 }
  0x62   : > { %347 = vmatpush.msrb.mxu1 %v257_v30  ;;  %489 = vmatpush.msrb.mxu2 %v446_v56  ;;  %v475_v30 = vld [vmem:[#allocation7 + $0x138] sm:$0xff] }
  0x63   : > { %320 = vmatmul.f32.gmra.mxu2 %v1302_v45  ;;  %554 = vmatpush.msrb.mxu3 %v462_v57 }
  0x64   : > { %348 = vmatpush.msrb.mxu1 %v255_v31  ;;  %332 = vmatmul.f32.gmra.mxu3 %v1315_v60  ;;  %v474_v31 = vld [vmem:[#allocation7 + $0x130] sm:$0xff] }
  0x65   : > { %490 = vmatpush.msrb.mxu2 %v445_v58  ;;  %555 = vmatpush.msrb.mxu3 %v461_v59 }
  0x66   : > { %349 = vmatpush.msrb.mxu1 %v253_v32  ;;  %618 = vmatpush.msrb.mxu0 %v479_v24  ;;  %v473_v32 = vld [vmem:[#allocation7 + $0x128] sm:$0xff] }
  0x67   : > { %491 = vmatpush.msrb.mxu2 %v444_v61  ;;  %556 = vmatpush.msrb.mxu3 %v460_v62 }
  0x68   : > { %350 = vmatpush.msrb.mxu1 %v251_v33  ;;  %619 = vmatpush.msrb.mxu0 %v478_v25  ;;  %v472_v33 = vld [vmem:[#allocation7 + $0x120] sm:$0xff] }
  0x69   : > { %299 = vmatmul.f32.gmra.mxu0 %v1277_v34  ;;  %311 = vmatmul.f32.gmra.mxu1 %v1280_v35 }
  0x6a   : > { %351 = vmatpush.msrb.mxu1 %v249_v36  ;;  %492 = vmatpush.msrb.mxu2 %v443_v63  ;;  %v471_v36 = vld [vmem:[#allocation7 + $0x118] sm:$0xff] }
  0x6b   : > { %323 = vmatmul.f32.gmra.mxu2 %v1311_v55  ;;  %557 = vmatpush.msrb.mxu3 %v459_v0 }
  0x6c   : > { %352 = vmatpush.msrb.mxu1 %v247_v37  ;;  %493 = vmatpush.msrb.mxu2 %v442_v1  ;;  %v470_v37 = vld [vmem:[#allocation7 + $0x110] sm:$0xff] }
  0x6d   : > { %558 = vmatpush.msrb.mxu3 %v458_v2  ;;  %620 = vmatpush.msrb.mxu0 %v477_v26 }
  0x6e   : > { %353 = vmatpush.msrb.mxu1 %v245_v38  ;;  %335 = vmatmul.f32.gmra.mxu3 %v1320_v5  ;;  %v469_v38 = vld [vmem:[#allocation7 + $0x108] sm:$0xff] }
  0x6f   : > { %494 = vmatpush.msrb.mxu2 %v441_v3  ;;  %559 = vmatpush.msrb.mxu3 %v457_v4 }
  0x70   : > { %354 = vmatpush.msrb.mxu1 %v243_v39  ;;  %621 = vmatpush.msrb.mxu0 %v476_v27 }
  0x71   : > { %355 = vmatmul.f32.vlgmr.msrb.gmra.mxu1 %v1253_v16  ;;  %495 = vmatpush.msrb.mxu2 %v440_v6 }
  0x72   : > { %560 = vmatpush.msrb.mxu3 %v456_v7  ;;  %622 = vmatpush.msrb.mxu0 %v475_v30 }
  0x73   : > { %496 = vmatpush.msrb.mxu2 %v439_v8 }
  0x74   : > { %561 = vmatpush.msrb.mxu3 %v455_v9  ;;  %623 = vmatpush.msrb.mxu0 %v474_v31 }
  0x75   : > { %497 = vmatpush.msrb.mxu2 %v438_v10 }
  0x76   : > { %562 = vmatpush.msrb.mxu3 %v454_v11  ;;  %624 = vmatpush.msrb.mxu0 %v473_v32 }
  0x77   : > { %498 = vmatpush.msrb.mxu2 %v437_v12 }
  0x78   : > { %563 = vmatpush.msrb.mxu3 %v453_v13  ;;  %625 = vmatpush.msrb.mxu0 %v472_v33 }
  0x79   : > { %358 = vmatmul.f32.gmra.mxu1 %v1261_v22  ;;  %499 = vmatpush.msrb.mxu2 %v436_v14 }
  0x7a   : > { %564 = vmatpush.msrb.mxu3 %v452_v15  ;;  %500 = vmatmul.f32.vlgmr.msrb.gmra.mxu2 %v1253_v16 }
  0x7b   : > { %626 = vmatpush.msrb.mxu0 %v471_v36 }
  0x7d   : > { %627 = vmatpush.msrb.mxu0 %v470_v37 }
  0x7f   : > { %628 = vmatpush.msrb.mxu0 %v469_v38 }
  0x81   : > { %361 = vmatmul.f32.gmra.mxu1 %v1269_v28  ;;  %629 = vmatpush.msrb.mxu0 %v468_v46 }
  0x82   : > { %503 = vmatmul.f32.gmra.mxu2 %v1261_v22 }
  0x89   : > { %364 = vmatmul.f32.gmra.mxu1 %v1277_v34 }
  0x8a   : > { %506 = vmatmul.f32.gmra.mxu2 %v1269_v28 }
  0x91   : > { %367 = vmatmul.f32.gmra.mxu1 %v1256_v17 }
  0x92   : > { %509 = vmatmul.f32.gmra.mxu2 %v1277_v34 }
  0x99   : > { %370 = vmatmul.f32.gmra.mxu1 %v1264_v23 }
  0x9a   : > { %512 = vmatmul.f32.gmra.mxu2 %v1256_v17 }
  0xa1   : > { %373 = vmatmul.f32.gmra.mxu1 %v1272_v29 }
  0xa2   : > { %515 = vmatmul.f32.gmra.mxu2 %v1264_v23 }
  0xa9   : > { %376 = vmatmul.f32.gmra.mxu1 %v1280_v35 }
  0xaa   : > { %518 = vmatmul.f32.gmra.mxu2 %v1272_v29 }
  0xb1   : > { %379 = vmatmul.f32.gmra.mxu1 %v1288_v40 }
  0xb2   : > { %521 = vmatmul.f32.gmra.mxu2 %v1280_v35 }
  0xb9   : > { %382 = vmatmul.f32.gmra.mxu1 %v1293_v41 }
  0xba   : > { %524 = vmatmul.f32.gmra.mxu2 %v1288_v40 }
  0xc1   : > { %385 = vmatmul.f32.gmra.mxu1 %v1302_v45 }
  0xc2   : > { %527 = vmatmul.f32.gmra.mxu2 %v1293_v41 }
  0xc9   : > { %388 = vmatmul.f32.gmra.mxu1 %v1311_v55 }
  0xca   : > { %530 = vmatmul.f32.gmra.mxu2 %v1302_v45 }
  0xce   : > { %v291_v39 = vpop.f32.mrf.mxu0  ;;  %v303_v43 = vpop.f32.mrf.mxu1 }
  0xcf   : > { %v404_v44 = vmul.f32 %v291_v39, %v1253_v16  ;;  %v408_v59 = vmul.f32 %v303_v43, %v1256_v17 }
  0xd1   : > { %391 = vmatmul.f32.gmra.mxu1 %v1296_v42  ;;  %565 = vmatmul.f32.vlgmr.msrb.gmra.mxu3 %v404_v44 }
  0xd2   : > { %533 = vmatmul.f32.gmra.mxu2 %v1311_v55 }
  0xd6   : > { %v294_v47 = vpop.f32.mrf.mxu0  ;;  %v306_v48 = vpop.f32.mrf.mxu1 }
  0xd7   : > { %v405_v49 = vmul.f32 %v294_v47, %v1261_v22  ;;  %v409_v63 = vmul.f32 %v306_v48, %v1264_v23  ;;  %v327_v20 = vpop.f32.mrf.mxu3 }
  0xd8   : > { %v416_v21 = vmul.f32 %v327_v20, %v1296_v42 }
  0xd9   : > { %394 = vmatmul.f32.gmra.mxu1 %v1306_v50  ;;  %568 = vmatmul.f32.gmra.mxu3 %v405_v49 }
  0xda   : > { %536 = vmatmul.f32.gmra.mxu2 %v1296_v42 }
  0xde   : > { %v297_v51 = vpop.f32.mrf.mxu0  ;;  %v309_v52 = vpop.f32.mrf.mxu1 }
  0xdf   : > { %v406_v53 = vmul.f32 %v297_v51, %v1269_v28  ;;  %v410_v2 = vmul.f32 %v309_v52, %v1272_v29  ;;  %v330_v25 = vpop.f32.mrf.mxu3 }
  0xe0   : > { %v417_v26 = vmul.f32 %v330_v25, %v1306_v50 }
  0xe1   : > { %397 = vmatmul.f32.gmra.mxu1 %v1315_v60  ;;  %571 = vmatmul.f32.gmra.mxu3 %v406_v53 }
  0xe2   : > { %539 = vmatmul.f32.gmra.mxu2 %v1306_v50 }
  0xe6   : > { %v300_v54 = vpop.f32.mrf.mxu0  ;;  %v312_v56 = vpop.f32.mrf.mxu1 }
  0xe7   : > { %v407_v57 = vmul.f32 %v300_v54, %v1277_v34  ;;  %v411_v6 = vmul.f32 %v312_v56, %v1280_v35 }
  0xe9   : > { %400 = vmatmul.f32.gmra.mxu1 %v1320_v5  ;;  %574 = vmatmul.f32.gmra.mxu3 %v407_v57 }
  0xea   : > { %542 = vmatmul.f32.gmra.mxu2 %v1315_v60 }
  0xee   : > { %v356_v58 = vpop.f32.mrf.mxu1 }
  0xef   : > { %v420_v61 = vmul.f32 %v356_v58, %v1253_v16  ;;  %v315_v16 = vpop.f32.mrf.mxu2 }
  0xf1   : > { %577 = vmatmul.f32.gmra.mxu3 %v408_v59  ;;  %630 = vmatmul.f32.vlgmr.msrb.gmra.mxu0 %v420_v61 }
  0xf2   : > { %545 = vmatmul.f32.gmra.mxu2 %v1320_v5 }
  0xf6   : > { %v359_v62 = vpop.f32.mrf.mxu1 }
  0xf7   : > { %v421_v0 = vmul.f32 %v359_v62, %v1261_v22  ;;  %v412_v22 = vmul.f32 %v315_v16, %v1288_v40  ;;  %v318_v9 = vpop.f32.mrf.mxu2 }
  0xf8   : > { %v413_v10 = vmul.f32 %v318_v9, %v1293_v41 }
  0xf9   : > { %580 = vmatmul.f32.gmra.mxu3 %v409_v63  ;;  %633 = vmatmul.f32.gmra.mxu0 %v421_v0 }
  0xfe   : > { %v362_v1 = vpop.f32.mrf.mxu1 }
  0xff   : > { %v422_v3 = vmul.f32 %v362_v1, %v1269_v28 }
 0x101   : > { %583 = vmatmul.f32.gmra.mxu3 %v410_v2  ;;  %636 = vmatmul.f32.gmra.mxu0 %v422_v3 }
 0x106   : > { %v365_v4 = vpop.f32.mrf.mxu1 }
 0x107   : > { %v423_v7 = vmul.f32 %v365_v4, %v1277_v34  ;;  %v321_v34 = vpop.f32.mrf.mxu2 }
 0x108   : > { %v414_v13 = vmul.f32 %v321_v34, %v1302_v45 }
 0x109   : > { %586 = vmatmul.f32.gmra.mxu3 %v411_v6  ;;  %639 = vmatmul.f32.gmra.mxu0 %v423_v7 }
 0x10e   : > { %v368_v8 = vpop.f32.mrf.mxu1 }
 0x10f   : > { %v424_v28 = vmul.f32 %v368_v8, %v1256_v17  ;;  %v324_v17 = vpop.f32.mrf.mxu2 }
 0x110   : > { %v415_v18 = vmul.f32 %v324_v17, %v1311_v55 }
 0x111   : > { %642 = vmatmul.f32.gmra.mxu0 %v424_v28  ;;  %589 = vmatmul.f32.gmra.mxu3 %v412_v22 }
 0x116   : > { %v371_v11 = vpop.f32.mrf.mxu1 }
 0x117   : > { %v425_v12 = vmul.f32 %v371_v11, %v1264_v23  ;;  %v501_v39 = vpop.f32.mrf.mxu2 }
 0x119   : > { %645 = vmatmul.f32.gmra.mxu0 %v425_v12  ;;  %592 = vmatmul.f32.gmra.mxu3 %v413_v10 }
 0x11e   : > { %v374_v14 = vpop.f32.mrf.mxu1 }
 0x11f   : > { %v426_v15 = vmul.f32 %v374_v14, %v1272_v29  ;;  %v504_v46 = vpop.f32.mrf.mxu2 }
 0x121   : > { %648 = vmatmul.f32.gmra.mxu0 %v426_v15  ;;  %595 = vmatmul.f32.gmra.mxu3 %v414_v13 }
 0x126   : > { %v377_v19 = vpop.f32.mrf.mxu1 }
 0x127   : > { %v427_v23 = vmul.f32 %v377_v19, %v1280_v35  ;;  %v333_v35 = vpop.f32.mrf.mxu3  ;;  %v507_v52 = vpop.f32.mrf.mxu2 }
 0x128   : > { %v418_v31 = vmul.f32 %v333_v35, %v1315_v60 }
 0x129   : > { %651 = vmatmul.f32.gmra.mxu0 %v427_v23  ;;  %598 = vmatmul.f32.gmra.mxu3 %v415_v18 }
 0x12e   : > { %v380_v24 = vpop.f32.mrf.mxu1 }
 0x12f   : > { %v428_v29 = vmul.f32 %v380_v24, %v1288_v40  ;;  %v336_v36 = vpop.f32.mrf.mxu3 }
 0x130   : > { %v419_v40 = vmul.f32 %v336_v36, %v1320_v5 }
 0x131   : > { %654 = vmatmul.f32.gmra.mxu0 %v428_v29  ;;  %601 = vmatmul.f32.gmra.mxu3 %v416_v21 }
 0x136   : > { %v383_v27 = vpop.f32.mrf.mxu1 }
 0x137   : > { %v429_v30 = vmul.f32 %v383_v27, %v1293_v41 }
 0x139   : > { %657 = vmatmul.f32.gmra.mxu0 %v429_v30  ;;  %604 = vmatmul.f32.gmra.mxu3 %v417_v26 }
 0x13e   : > { %v386_v32 = vpop.f32.mrf.mxu1 }
 0x13f   : > { %v430_v33 = vmul.f32 %v386_v32, %v1302_v45 }
 0x141   : > { %660 = vmatmul.f32.gmra.mxu0 %v430_v33  ;;  %607 = vmatmul.f32.gmra.mxu3 %v418_v31 }
 0x146   : > { %v389_v37 = vpop.f32.mrf.mxu1 }
 0x147   : > { %v431_v38 = vmul.f32 %v389_v37, %v1311_v55 }
 0x149   : > { %663 = vmatmul.f32.gmra.mxu0 %v431_v38  ;;  %610 = vmatmul.f32.gmra.mxu3 %v419_v40 }
 0x14e   : > { %v392_v41 = vpop.f32.mrf.mxu1 }
 0x14f   : > { %v432_v43 = vmul.f32 %v392_v41, %v1296_v42  ;;  %v510_v42 = vpop.f32.mrf.mxu2 }
 0x151   : > { %666 = vmatmul.f32.gmra.mxu0 %v432_v43 }
 0x154   : > { %v566_v44 = vpop.f32.mrf.mxu3 }
 0x155   : > { %v567_v56 = vadd.f32 %v566_v44, %v501_v39 }
 0x156   : > { %v395_v47 = vpop.f32.mrf.mxu1 }
 0x157   : > { %v433_v45 = vmul.f32 %v395_v47, %v1306_v50 }
 0x159   : > { %669 = vmatmul.f32.gmra.mxu0 %v433_v45 }
 0x15c   : > { %v569_v48 = vpop.f32.mrf.mxu3 }
 0x15d   : > { %v570_v50 = vadd.f32 %v569_v48, %v504_v46 }
 0x15e   : > { %v398_v49 = vpop.f32.mrf.mxu1 }
 0x15f   : > { %v434_v51 = vmul.f32 %v398_v49, %v1315_v60  ;;  %v513_v60 = vpop.f32.mrf.mxu2 }
 0x161   : > { %672 = vmatmul.f32.gmra.mxu0 %v434_v51 }
 0x164   : > { %v572_v55 = vpop.f32.mrf.mxu3 }
 0x166   : > { %v401_v53 = vpop.f32.mrf.mxu1 }
 0x167   : > { %v435_v54 = vmul.f32 %v401_v53, %v1320_v5  ;;  %v573_v5 = vadd.f32 %v572_v55, %v507_v52  ;;  %v516_v0 = vpop.f32.mrf.mxu2 }
 0x169   : > { %675 = vmatmul.f32.gmra.mxu0 %v435_v54 }
 0x16c   : > { %v575_v57 = vpop.f32.mrf.mxu3 }
 0x16d   : > { %v576_v16 = vadd.f32 %v575_v57, %v510_v42 }
 0x16e   : > { %v631_v58 = vpop.f32.mrf.mxu0 }
 0x16f   : > { %v632_v59 = vadd.f32 %v631_v58, %v567_v56  ;;  %v519_v6 = vpop.f32.mrf.mxu2 }
 0x171   : > { %679 = vst [vmem:[%s1382_s18] sm:$0xff] %v632_v59 }
 0x174   : > { %v578_v61 = vpop.f32.mrf.mxu3 }
 0x175   : > { %v579_v8 = vadd.f32 %v578_v61, %v513_v60 }
 0x176   : > { %v634_v62 = vpop.f32.mrf.mxu0 }
 0x177   : > { %v635_v63 = vadd.f32 %v634_v62, %v570_v50  ;;  %v522_v10 = vpop.f32.mrf.mxu2 }
 0x179   : > { %680 = vst [vmem:[%s1382_s18 + $0x8] sm:$0xff] %v635_v63 }
 0x17c   : > { %v581_v1 = vpop.f32.mrf.mxu3 }
 0x17d   : > { %v582_v12 = vadd.f32 %v581_v1, %v516_v0 }
 0x17e   : > { %v637_v2 = vpop.f32.mrf.mxu0 }
 0x17f   : > { %v638_v3 = vadd.f32 %v637_v2, %v573_v5  ;;  %v525_v14 = vpop.f32.mrf.mxu2 }
 0x181   : > { %681 = vst [vmem:[%s1382_s18 + $0x10] sm:$0xff] %v638_v3 }
 0x184   : > { %v584_v22 = vpop.f32.mrf.mxu3 }
 0x185   : > { %v585_v17 = vadd.f32 %v584_v22, %v519_v6 }
 0x186   : > { %v640_v4 = vpop.f32.mrf.mxu0 }
 0x187   : > { %v641_v7 = vadd.f32 %v640_v4, %v576_v16  ;;  %v528_v20 = vpop.f32.mrf.mxu2 }
 0x189   : > { %682 = vst [vmem:[%s1382_s18 + $0x18] sm:$0xff] %v641_v7 }
 0x18c   : > { %v587_v11 = vpop.f32.mrf.mxu3 }
 0x18d   : > { %v588_v21 = vadd.f32 %v587_v11, %v522_v10 }
 0x18e   : > { %v643_v9 = vpop.f32.mrf.mxu0 }
 0x18f   : > { %v644_v28 = vadd.f32 %v643_v9, %v579_v8  ;;  %v531_v26 = vpop.f32.mrf.mxu2 }
 0x191   : > { %683 = vst [vmem:[%s1382_s18 + $0x20] sm:$0xff] %v644_v28 }
 0x194   : > { %v590_v15 = vpop.f32.mrf.mxu3 }
 0x195   : > { %v591_v25 = vadd.f32 %v590_v15, %v525_v14 }
 0x196   : > { %v646_v34 = vpop.f32.mrf.mxu0 }
 0x197   : > { %v647_v13 = vadd.f32 %v646_v34, %v582_v12  ;;  %v534_v36 = vpop.f32.mrf.mxu2 }
 0x199   : > { %684 = vst [vmem:[%s1382_s18 + $0x28] sm:$0xff] %v647_v13 }
 0x19c   : > { %v593_v23 = vpop.f32.mrf.mxu3 }
 0x19d   : > { %v594_v31 = vadd.f32 %v593_v23, %v528_v20 }
 0x19e   : > { %v649_v18 = vpop.f32.mrf.mxu0 }
 0x19f   : > { %v650_v19 = vadd.f32 %v649_v18, %v585_v17  ;;  %v537_v41 = vpop.f32.mrf.mxu2 }
 0x1a1   : > { %685 = vst [vmem:[%s1382_s18 + $0x30] sm:$0xff] %v650_v19 }
 0x1a4   : > { %v596_v30 = vpop.f32.mrf.mxu3 }
 0x1a5   : > { %v597_v37 = vadd.f32 %v596_v30, %v531_v26 }
 0x1a6   : > { %v652_v24 = vpop.f32.mrf.mxu0 }
 0x1a7   : > { %v653_v29 = vadd.f32 %v652_v24, %v588_v21  ;;  %v540_v48 = vpop.f32.mrf.mxu2 }
 0x1a9   : > { %686 = vst [vmem:[%s1382_s18 + $0x38] sm:$0xff] %v653_v29 }
 0x1ac   : > { %v599_v40 = vpop.f32.mrf.mxu3 }
 0x1ad   : > { %v600_v44 = vadd.f32 %v599_v40, %v534_v36 }
 0x1ae   : > { %v655_v27 = vpop.f32.mrf.mxu0 }
 0x1af   : > { %v656_v35 = vadd.f32 %v655_v27, %v591_v25  ;;  %v543_v53 = vpop.f32.mrf.mxu2 }
 0x1b1   : > { %687 = vst [vmem:[%s1382_s18 + $0x40] sm:$0xff] %v656_v35 }
 0x1b4   : > { %v602_v43 = vpop.f32.mrf.mxu3 }
 0x1b5   : > { %v603_v45 = vadd.f32 %v602_v43, %v537_v41 }
 0x1b6   : > { %v658_v32 = vpop.f32.mrf.mxu0 }
 0x1b7   : > { %v659_v33 = vadd.f32 %v658_v32, %v594_v31  ;;  %v546_v50 = vpop.f32.mrf.mxu2 }
 0x1b9   : > { %688 = vst [vmem:[%s1382_s18 + $0x48] sm:$0xff] %v659_v33 }
 0x1bc   : > { %v605_v49 = vpop.f32.mrf.mxu3 }
 0x1bd   : > { %v606_v55 = vadd.f32 %v605_v49, %v540_v48 }
 0x1be   : > { %v661_v38 = vpop.f32.mrf.mxu0 }
 0x1bf   : > { %v662_v39 = vadd.f32 %v661_v38, %v597_v37 }
 0x1c1   : > { %689 = vst [vmem:[%s1382_s18 + $0x50] sm:$0xff] %v662_v39 }
 0x1c4   : > { %v608_v42 = vpop.f32.mrf.mxu3 }
 0x1c5   : > { %v609_v57 = vadd.f32 %v608_v42, %v543_v53 }
 0x1c6   : > { %v664_v46 = vpop.f32.mrf.mxu0 }
 0x1c7   : > { %v665_v47 = vadd.f32 %v664_v46, %v600_v44 }
 0x1c9   : > { %690 = vst [vmem:[%s1382_s18 + $0x58] sm:$0xff] %v665_v47 }
 0x1cc   : > { %v611_v60 = vpop.f32.mrf.mxu3 }
 0x1cd   : > { %v612_v61 = vadd.f32 %v611_v60, %v546_v50 }
 0x1ce   : > { %v667_v51 = vpop.f32.mrf.mxu0 }
 0x1cf   : > { %v668_v52 = vadd.f32 %v667_v51, %v603_v45 }
 0x1d1   : > { %691 = vst [vmem:[%s1382_s18 + $0x60] sm:$0xff] %v668_v52 }
 0x1d6   : > { %v670_v54 = vpop.f32.mrf.mxu0 }
 0x1d7   : > { %v671_v56 = vadd.f32 %v670_v54, %v606_v55 }
 0x1d9   : > { %692 = vst [vmem:[%s1382_s18 + $0x68] sm:$0xff] %v671_v56 }
 0x1de   : > { %v673_v58 = vpop.f32.mrf.mxu0 }
 0x1df   : > { %v674_v59 = vadd.f32 %v673_v58, %v609_v57 }
 0x1e1   : > { %693 = vst [vmem:[%s1382_s18 + $0x70] sm:$0xff] %v674_v59 }
 0x1e6   : > { %v676_v62 = vpop.f32.mrf.mxu0 }
 0x1e7   : > { %v677_v63 = vadd.f32 %v676_v62, %v612_v61 }
 0x1e9   : > { %694 = vst [vmem:[%s1382_s18 + $0x78] sm:$0xff] %v677_v63 }
 0x1ea   : > { %1061 = shalt.err (!%p1058_p10)
}
 0x1eb   : > { %s1112_s20 = smov 128   ;;  %s1113_s26 = smov 8  }
 0x1ec   : > { %881 = dma.vmem_to_hbm [thread:$0]  (%p1206_p5), %s709_s29, 2048, %s711_s30, %s696_s4, %s1112_s20, %s1112_s20, %s1113_s26  }
 0x1ed PF: > { %s725_s27 = sand.u32 1, %s1092_s12   ;;  %p1443_p12 = scmp.ge.s32.totalorder %s1104_s15, 2 }
 0x1ee   : > { %s726_s5 = scalar_lea.sflag [#allocation4], %s725_s27 }
 0x1ef   : > { %p895_p13 = pnand %p1443_p12, %p1169_p6 }
 0x1f1   : > { %p896_p0 = pneg %p895_p13 }
 0x1f3   : > { %1087 = dma.done.wait (%p896_p0), %s726_s5, 2048  }
 0x1f4   : > { %1089 = vsyncadd (%p896_p0), %s726_s5, 4294965248  ;;  %p17_p3 = scmp.ge.s32.totalorder %s1193_s8, 4   ;;  %s1444_s12 = smov %s1096_s13 }
 0x1f5   : > { %s1445_s13 = smov %s1100_s14  ;;  %s1446_s14 = smov %s1202_s11 }
 0x1f6   : > { %s1447_s15 = smov %s1193_s8  ;;  %19 = sbr.rel (!%p17_p3) target bundleno = 6 (0x6), region = 85 }
 0x1fb   :  { %732 = vsyncpa [#allocation3], 1 }
 0x1fc   :  { %734 = vsyncpa [#allocation3 + $0x1], 1 }
 0x1fd   :  { %735 = vsyncpa [#allocation6], 1 }
 0x1fe   :  { %736 = vsyncpa [#allocation4], 1 }
 0x1ff   :  { %738 = vsyncpa [#allocation4 + $0x1], 1 }

</bundles_post_ra>
